<compile_context>
chip_gen: v7x
topology: tpu7x:2x2x1
jax: 0.10.0
libtpu: 0.0.40
codegen_flags: <defaults>
</compile_context>

<pallas_src>
import math

import jax
import jax.numpy as jnp
from jax.experimental import pallas as pl
from jax.experimental.pallas import tpu as pltpu


# --------------------------------------------------------------------------
# Cache construction (mirrors _get_factor / _set_cos_sin_cache).
# cos/sin stored at half width: the PyTorch cache is cat(freqs, freqs), so the
# two halves are identical -- shipping half width halves HBM gather traffic.
# --------------------------------------------------------------------------
def _get_factor(dim, max_position_embeddings, base, beta_slow, beta_fast):
    fast_dim = dim / 2 * (
        math.log(max_position_embeddings / (2 * math.pi * beta_fast)) / math.log(base))
    fast_dim = max(math.floor(fast_dim), 0)
    slow_dim = dim / 2 * (
        math.log(max_position_embeddings / (2 * math.pi * beta_slow)) / math.log(base))
    slow_dim = min(math.ceil(slow_dim), dim - 1)
    if fast_dim == slow_dim:
        slow_dim += 0.001
    dim_arange = jnp.arange(0, dim // 2, dtype=jnp.float32)
    dim_factor = jnp.clip((dim_arange - fast_dim) / (slow_dim - fast_dim), 0.0, 1.0)
    return 1.0 - dim_factor


def _build_cache(dim, seq_len, base, scaling_factor, max_position_embeddings,
                 beta_slow, beta_fast):
    dim_arange = jnp.arange(0, dim, 2, dtype=jnp.float32) / dim
    theta = 1.0 / (jnp.asarray(base, jnp.float32) ** dim_arange)
    interleave_theta = theta / scaling_factor
    factor = _get_factor(dim, max_position_embeddings, base, beta_slow, beta_fast)
    yarn_theta = factor * theta + (1.0 - factor) * interleave_theta

    positions = jnp.arange(seq_len, dtype=jnp.float32)
    freqs = jnp.outer(positions, yarn_theta)                       # [S, D/2]
    temperature = (0.07 * jnp.log((positions + 1.0) / max_position_embeddings) + 1.0) ** 2
    temperature = jnp.where(positions < max_position_embeddings, 1.0, temperature)
    # all float32
    return jnp.cos(freqs), jnp.sin(freqs), temperature[:, None]


# --------------------------------------------------------------------------
# Pallas kernels
# --------------------------------------------------------------------------
def _widen(cos_h, sin_h):
    """cos_h/sin_h: (tS, D/2) f32 -> full-width [cos,cos], [-sin,sin]."""
    cos_w = jnp.concatenate([cos_h, cos_h], axis=-1)
    sin_w = jnp.concatenate([-sin_h, sin_h], axis=-1)
    return cos_w, sin_w


def _rotate_heads(x_ref, o_ref, cosw_sc, sinw_sc):
    """x_ref/o_ref blocks: (1, nH, tS, D); cosw/sinw scratch: (tS, D) f32.

    x*cos + rotate_half(x)*sin == x*[cos,cos] + roll(x, D/2)*[-sin, sin]
    (roll along the lane axis by D/2 gives [x2, x1]; sign folded into sin).
    """
    nH = x_ref.shape[1]
    D = x_ref.shape[3]
    half = D // 2
    cw = cosw_sc[...]
    sw = sinw_sc[...]
    for h in range(nH):                       # small static unroll over heads
        x = x_ref[0, h].astype(jnp.float32)   # (tS, D)
        rot = pltpu.roll(x, shift=half, axis=1)   # positive lane axis (XLU)
        o_ref[0, h] = (x * cw + rot * sw).astype(o_ref.dtype)


def _rope_k_kernel(x_ref, cos_ref, sin_ref, o_ref, cosw_sc, sinw_sc):
    @pl.when(pl.program_id(2) == 0)
    def _():
        cw, sw = _widen(cos_ref[0], sin_ref[0])
        cosw_sc[...] = cw
        sinw_sc[...] = sw
    _rotate_heads(x_ref, o_ref, cosw_sc, sinw_sc)


def _rope_q_kernel(x_ref, cos_ref, sin_ref, temp_ref, o_ref, cosw_sc, sinw_sc):
    @pl.when(pl.program_id(2) == 0)
    def _():
        t = temp_ref[0]                               # (tS, 1) f32
        cw, sw = _widen(cos_ref[0] * t, sin_ref[0] * t)   # temperature folded in
        cosw_sc[...] = cw
        sinw_sc[...] = sw
    _rotate_heads(x_ref, o_ref, cosw_sc, sinw_sc)


# --------------------------------------------------------------------------
# Tiling / VMEM budget helpers
# --------------------------------------------------------------------------
def _vmem_limit_bytes():
    # Per-generation budget: v5e/v6e have 128 MiB physical VMEM, v7x has 64 MiB.
    try:
        cap = int(pltpu.get_tpu_info().vmem_capacity_bytes)
    except Exception:
        cap = 128 * 1024 * 1024
    return max(32 * 1024 * 1024, min(int(cap * 0.6), 80 * 1024 * 1024))


def _choose_tiles(H, S, D, itemsize, vmem_limit):
    # Heads per block: largest divisor of H up to 8 (cos/sin reuse across them
    # is free via scratch; bigger blocks amortize per-step overhead).
    nH = 1
    for cand in range(min(H, 8), 0, -1):
        if H % cand == 0:
            nH = cand
            break
    # Sublane packing per dtype: f32 -> 8, bf16 -> 16, int8/fp8 -> 32.
    pack = max(8, 32 // max(1, itemsize))
    # Target ~4 MiB of activation-input bytes per grid step.
    target = 4 << 20
    rows = target // max(1, nH * D * itemsize)
    rows = max(pack, (rows // pack) * pack)
    tS = S if S <= rows else rows

    def footprint(ts):
        x_bytes = nH * ts * D * itemsize          # one x block
        cs_bytes = ts * (D // 2) * 4              # one cos or sin block (f32)
        t_bytes = ts * 4
        scratch = 2 * ts * D * 4                  # widened cos/sin scratch
        # double-buffered: (x in + x out + cos + sin + temp) per pipeline stage
        return 2 * (2 * x_bytes + 2 * cs_bytes + t_bytes) + scratch

    while tS > pack and tS < S and footprint(tS) > int(vmem_limit * 0.6):
        tS = max(pack, ((tS // 2) // pack) * pack)
    return nH, tS


# --------------------------------------------------------------------------
# Pallas wrapper: grid (B, S-tiles, H-tiles) with the head axis innermost so
# the shared cos/sin/temperature blocks (and the widened scratch) are reused
# across head steps without re-DMA / re-widening.
# --------------------------------------------------------------------------
def _apply_rope(x, cos_h, sin_h, temp=None):
    B, H, S, D = x.shape
    Dh = D // 2
    itemsize = jnp.dtype(x.dtype).itemsize
    vmem_limit = _vmem_limit_bytes()
    nH, tS = _choose_tiles(H, S, D, itemsize, vmem_limit)
    grid = (B, pl.cdiv(S, tS), H // nH)

    x_spec = pl.BlockSpec((1, nH, tS, D), lambda b, s, h: (b, h, s, 0))
    cs_spec = pl.BlockSpec((1, tS, Dh), lambda b, s, h: (b, s, 0))

    in_specs = [x_spec, cs_spec, cs_spec]
    args = [x, cos_h, sin_h]
    kernel = _rope_k_kernel
    if temp is not None:
        in_specs.append(pl.BlockSpec((1, tS, 1), lambda b, s, h: (b, s, 0)))
        args.append(temp)
        kernel = _rope_q_kernel

    return pl.pallas_call(
        kernel,
        out_shape=jax.ShapeDtypeStruct(x.shape, x.dtype),
        grid_spec=pltpu.PrefetchScalarGridSpec(
            num_scalar_prefetch=0,
            grid=grid,
            in_specs=in_specs,
            out_specs=x_spec,
            scratch_shapes=[pltpu.VMEM((tS, D), jnp.float32),
                            pltpu.VMEM((tS, D), jnp.float32)],
        ),
        compiler_params=pltpu.CompilerParams(
            # batch / seq tiles parallel (megacore sharding on v7x); head axis
            # must stay sequential ("arbitrary") so the widened cos/sin scratch
            # filled at head-step 0 is valid for every head step on that core.
            dimension_semantics=("parallel", "parallel", "arbitrary"),
            vmem_limit_bytes=vmem_limit,
        ),
    )(*args)


# --------------------------------------------------------------------------
# Module-equivalent wrapper
# --------------------------------------------------------------------------
class YarnDynamicTemperatureRotaryEmbedding:
    def __init__(self, dim, max_position_embeddings=2048, base=10000,
                 scaling_factor=1.0, beta_slow=2, beta_fast=128):
        self.dim = dim
        self.base = base
        self.scaling_factor = scaling_factor
        self.beta_slow = beta_slow
        self.beta_fast = beta_fast
        self.max_position_embeddings = max_position_embeddings
        self.max_seq_len_cached = math.ceil(max_position_embeddings * scaling_factor)
        self.cos_half, self.sin_half, self.temperature = _build_cache(
            dim, self.max_seq_len_cached, base, scaling_factor,
            max_position_embeddings, beta_slow, beta_fast)

    def __call__(self, q, k, position_ids, seq_len=None):
        # q: [B, Hq, Sq, D], k: [B, Hk, Sk, D], position_ids: [B, Sk]
        B, Hq, Sq, D = q.shape
        _, Hk, Sk, _ = k.shape

        if seq_len is None:
            # TODO(synk): device->host readback mirrors PyTorch's .item(); pass
            # seq_len statically when calling under jit to avoid the sync.
            seq_len = max(int(jax.device_get(jnp.max(position_ids))) + 1, Sk)
        if seq_len > self.max_seq_len_cached:
            # Cache growth mutates Python state; must happen outside a jit trace.
            self.scaling_factor = seq_len / self.max_position_embeddings
            self.cos_half, self.sin_half, self.temperature = _build_cache(
                self.dim, seq_len, self.base, self.scaling_factor,
                self.max_position_embeddings, self.beta_slow, self.beta_fast)
            self.max_seq_len_cached = seq_len

        # Plain-JAX gathers of the float32, half-width tables (arbitrary ids).
        # q uses the last Sq positions of position_ids (standard prefill/decode).
        k_cos = jnp.take(self.cos_half, position_ids, axis=0)      # [B, Sk, D/2]
        k_sin = jnp.take(self.sin_half, position_ids, axis=0)      # [B, Sk, D/2]
        q_pos = position_ids[:, -Sq:]
        q_cos = jnp.take(self.cos_half, q_pos, axis=0)              # [B, Sq, D/2]
        q_sin = jnp.take(self.sin_half, q_pos, axis=0)              # [B, Sq, D/2]
        temp = jnp.take(self.temperature, q_pos, axis=0)            # [B, Sq, 1]

        q_embed = _apply_rope(q, q_cos, q_sin, temp)
        k_embed = _apply_rope(k, k_cos, k_sin, None)
        return q_embed, k_embed


# --------------------------------------------------------------------------
# Pure-JAX reference (mirrors the PyTorch forward exactly)
# --------------------------------------------------------------------------
def _reference(rope, q, k, position_ids):
    def rotate_half(x):
        half = x.shape[-1] // 2
        return jnp.concatenate((-x[..., half:], x[..., :half]), axis=-1)

    Sq = q.shape[2]
    cos_full = jnp.concatenate([rope.cos_half, rope.cos_half], axis=-1)
    sin_full = jnp.concatenate([rope.sin_half, rope.sin_half], axis=-1)
    k_cos = jnp.take(cos_full, position_ids, axis=0)[:, None].astype(k.dtype)
    k_sin = jnp.take(sin_full, position_ids, axis=0)[:, None].astype(k.dtype)
    q_cos = k_cos[..., -Sq:, :]
    q_sin = k_sin[..., -Sq:, :]
    q_pos = position_ids[:, -Sq:]
    temperature = jnp.take(rope.temperature, q_pos, axis=0)[:, None].astype(k.dtype)
    q_cos = q_cos * temperature
    q_sin = q_sin * temperature
    q_embed = q * q_cos + rotate_half(q) * q_sin
    k_embed = k * k_cos + rotate_half(k) * k_sin
    return q_embed, k_embed


if __name__ == "__main__":
    # Small GQA-style shapes: different head counts and Sq < Sk exercise the
    # independently tiled q/k paths and the suffix position handling.
    B, Hq, Hk, Sq, Sk, D = 2, 4, 2, 4, 8, 128
    max_pos = 16
    scaling_factor = 4.0   # cache covers 64 positions; some get temperature != 1

    key = jax.random.PRNGKey(0)
    kq, kk = jax.random.split(key)
    q = jax.random.normal(kq, (B, Hq, Sq, D), dtype=jnp.float32)
    k = jax.random.normal(kk, (B, Hk, Sk, D), dtype=jnp.float32)
    # positions past max_position_embeddings exercise the dynamic temperature path
    position_ids = jnp.stack(
        [jnp.arange(Sk) + 4, jnp.arange(Sk) + 20], axis=0).astype(jnp.int32)

    rope = YarnDynamicTemperatureRotaryEmbedding(
        dim=D, max_position_embeddings=max_pos, base=10000,
        scaling_factor=scaling_factor)

    q_embed, k_embed = rope(q, k, position_ids)
    jax.block_until_ready((q_embed, k_embed))

    q_ref, k_ref = _reference(rope, q, k, position_ids)
    assert q_embed.shape == q.shape and k_embed.shape == k.shape
    assert jnp.allclose(q_embed, q_ref, atol=1e-5, rtol=1e-5)
    assert jnp.allclose(k_embed, k_ref, atol=1e-5, rtol=1e-5)

    print("KERNEL_OK")
</pallas_src>

<mosaic_0001>
module attributes {stable_mosaic.version = 11 : i64} {
  func.func @_rope_q_kernel(%arg0: i32, %arg1: i32, %arg2: i32, %arg3: memref<1x4x4x128xf32, #tpu.memory_space<vmem>>, %arg4: memref<1x4x64xf32, #tpu.memory_space<vmem>>, %arg5: memref<1x4x64xf32, #tpu.memory_space<vmem>>, %arg6: memref<1x4x1xf32, #tpu.memory_space<vmem>>, %arg7: memref<1x4x4x128xf32, #tpu.memory_space<vmem>>, %arg8: memref<4x128xf32, #tpu.memory_space<vmem>>, %arg9: memref<4x128xf32, #tpu.memory_space<vmem>>) attributes {dimension_semantics = [#tpu.dimension_semantics<parallel>, #tpu.dimension_semantics<parallel>, #tpu.dimension_semantics<arbitrary>], iteration_bounds = array<i64: 2, 1, 1>, scalar_prefetch = 0 : i64, scratch_operands = 2 : i64, tpu.core_type = #tpu.core_type<tc>, window_params = [{transform_indices = @transform_0, window_bounds = array<i64: 1, 4, 4, 128>}, {transform_indices = @transform_1, window_bounds = array<i64: 1, 4, 64>}, {transform_indices = @transform_2, window_bounds = array<i64: 1, 4, 64>}, {transform_indices = @transform_3, window_bounds = array<i64: 1, 4, 1>}, {transform_indices = @transform_4, window_bounds = array<i64: 1, 4, 4, 128>}]} {
    %c0_i32 = arith.constant 0 : i32
    %0 = arith.cmpi eq, %arg2, %c0_i32 : i32
    %1 = arith.extui %0 : i1 to i32
    %c0_i32_0 = arith.constant 0 : i32
    %2 = arith.cmpi ne, %1, %c0_i32_0 : i32
    scf.if %2 {
      %c0_36 = arith.constant 0 : index
      %c0_37 = arith.constant 0 : index
      %c0_38 = arith.constant 0 : index
      %41 = vector.load %arg6[%c0_36, %c0_37, %c0_38] : memref<1x4x1xf32, #tpu.memory_space<vmem>>, vector<1x4x1xf32>
      %42 = vector.shape_cast %41 : vector<1x4x1xf32> to vector<4x1xf32>
      %c0_39 = arith.constant 0 : index
      %c0_40 = arith.constant 0 : index
      %c0_41 = arith.constant 0 : index
      %43 = vector.load %arg4[%c0_39, %c0_40, %c0_41] : memref<1x4x64xf32, #tpu.memory_space<vmem>>, vector<1x4x64xf32>
      %44 = vector.shape_cast %43 : vector<1x4x64xf32> to vector<4x64xf32>
      %45 = vector.broadcast %42 : vector<4x1xf32> to vector<4x64xf32>
      %46 = arith.mulf %44, %45 : vector<4x64xf32>
      %c0_42 = arith.constant 0 : index
      %c0_43 = arith.constant 0 : index
      %c0_44 = arith.constant 0 : index
      %47 = vector.load %arg5[%c0_42, %c0_43, %c0_44] : memref<1x4x64xf32, #tpu.memory_space<vmem>>, vector<1x4x64xf32>
      %48 = vector.shape_cast %47 : vector<1x4x64xf32> to vector<4x64xf32>
      %49 = vector.broadcast %42 : vector<4x1xf32> to vector<4x64xf32>
      %50 = arith.mulf %48, %49 : vector<4x64xf32>
      %51 = tpu.concatenate %46, %46 in 1 : vector<4x64xf32>, vector<4x64xf32> -> vector<4x128xf32>
      %cst = arith.constant 0.000000e+00 : f32
      %52 = vector.broadcast %cst : f32 to vector<4x64xf32>
      %53 = arith.subf %52, %50 : vector<4x64xf32>
      %54 = tpu.concatenate %53, %50 in 1 : vector<4x64xf32>, vector<4x64xf32> -> vector<4x128xf32>
      %c0_45 = arith.constant 0 : index
      %c0_46 = arith.constant 0 : index
      %55 = vector.load %arg8[%c0_45, %c0_46] : memref<4x128xf32, #tpu.memory_space<vmem>>, vector<4x128xf32>
      tpu.vector_store %arg8[%c0_45, %c0_46], %51 {strides = array<i32>} : memref<4x128xf32, #tpu.memory_space<vmem>>, vector<4x128xf32>,
      %c0_47 = arith.constant 0 : index
      %c0_48 = arith.constant 0 : index
      %56 = vector.load %arg9[%c0_47, %c0_48] : memref<4x128xf32, #tpu.memory_space<vmem>>, vector<4x128xf32>
      tpu.vector_store %arg9[%c0_47, %c0_48], %54 {strides = array<i32>} : memref<4x128xf32, #tpu.memory_space<vmem>>, vector<4x128xf32>,
    } else {
    }
    %c0 = arith.constant 0 : index
    %c0_1 = arith.constant 0 : index
    %3 = vector.load %arg8[%c0, %c0_1] : memref<4x128xf32, #tpu.memory_space<vmem>>, vector<4x128xf32>
    %c0_2 = arith.constant 0 : index
    %c0_3 = arith.constant 0 : index
    %4 = vector.load %arg9[%c0_2, %c0_3] : memref<4x128xf32, #tpu.memory_space<vmem>>, vector<4x128xf32>
    %c0_4 = arith.constant 0 : index
    %c0_5 = arith.constant 0 : index
    %c0_6 = arith.constant 0 : index
    %c0_7 = arith.constant 0 : index
    %5 = vector.load %arg3[%c0_4, %c0_5, %c0_6, %c0_7] : memref<1x4x4x128xf32, #tpu.memory_space<vmem>>, vector<1x1x4x128xf32>
    %6 = vector.shape_cast %5 : vector<1x1x4x128xf32> to vector<4x128xf32>
    %c64_i32 = arith.constant 64 : i32
    %7 = tpu.dynamic_rotate %6 by %c64_i32 dim 1 : vector<4x128xf32>, i32 -> vector<4x128xf32>
    %8 = arith.mulf %6, %3 : vector<4x128xf32>
    %9 = arith.mulf %7, %4 : vector<4x128xf32>
    %10 = arith.addf %8, %9 : vector<4x128xf32>
    %c0_8 = arith.constant 0 : index
    %c0_9 = arith.constant 0 : index
    %c0_10 = arith.constant 0 : index
    %c0_11 = arith.constant 0 : index
    %11 = vector.load %arg7[%c0_8, %c0_9, %c0_10, %c0_11] : memref<1x4x4x128xf32, #tpu.memory_space<vmem>>, vector<1x1x4x128xf32>
    %12 = vector.shape_cast %11 : vector<1x1x4x128xf32> to vector<4x128xf32>
    %13 = vector.shape_cast %10 : vector<4x128xf32> to vector<1x1x4x128xf32>
    tpu.vector_store %arg7[%c0_8, %c0_9, %c0_10, %c0_11], %13 {strides = array<i32>} : memref<1x4x4x128xf32, #tpu.memory_space<vmem>>, vector<1x1x4x128xf32>,
    %c0_12 = arith.constant 0 : index
    %c1 = arith.constant 1 : index
    %c0_13 = arith.constant 0 : index
    %c0_14 = arith.constant 0 : index
    %14 = vector.load %arg3[%c0_12, %c1, %c0_13, %c0_14] : memref<1x4x4x128xf32, #tpu.memory_space<vmem>>, vector<1x1x4x128xf32>
    %15 = vector.shape_cast %14 : vector<1x1x4x128xf32> to vector<4x128xf32>
    %c64_i32_15 = arith.constant 64 : i32
    %16 = tpu.dynamic_rotate %15 by %c64_i32_15 dim 1 : vector<4x128xf32>, i32 -> vector<4x128xf32>
    %17 = arith.mulf %15, %3 : vector<4x128xf32>
    %18 = arith.mulf %16, %4 : vector<4x128xf32>
    %19 = arith.addf %17, %18 : vector<4x128xf32>
    %c0_16 = arith.constant 0 : index
    %c1_17 = arith.constant 1 : index
    %c0_18 = arith.constant 0 : index
    %c0_19 = arith.constant 0 : index
    %20 = vector.load %arg7[%c0_16, %c1_17, %c0_18, %c0_19] : memref<1x4x4x128xf32, #tpu.memory_space<vmem>>, vector<1x1x4x128xf32>
    %21 = vector.shape_cast %20 : vector<1x1x4x128xf32> to vector<4x128xf32>
    %22 = vector.shape_cast %19 : vector<4x128xf32> to vector<1x1x4x128xf32>
    tpu.vector_store %arg7[%c0_16, %c1_17, %c0_18, %c0_19], %22 {strides = array<i32>} : memref<1x4x4x128xf32, #tpu.memory_space<vmem>>, vector<1x1x4x128xf32>,
    %c0_20 = arith.constant 0 : index
    %c2 = arith.constant 2 : index
    %c0_21 = arith.constant 0 : index
    %c0_22 = arith.constant 0 : index
    %23 = vector.load %arg3[%c0_20, %c2, %c0_21, %c0_22] : memref<1x4x4x128xf32, #tpu.memory_space<vmem>>, vector<1x1x4x128xf32>
    %24 = vector.shape_cast %23 : vector<1x1x4x128xf32> to vector<4x128xf32>
    %c64_i32_23 = arith.constant 64 : i32
    %25 = tpu.dynamic_rotate %24 by %c64_i32_23 dim 1 : vector<4x128xf32>, i32 -> vector<4x128xf32>
    %26 = arith.mulf %24, %3 : vector<4x128xf32>
    %27 = arith.mulf %25, %4 : vector<4x128xf32>
    %28 = arith.addf %26, %27 : vector<4x128xf32>
    %c0_24 = arith.constant 0 : index
    %c2_25 = arith.constant 2 : index
    %c0_26 = arith.constant 0 : index
    %c0_27 = arith.constant 0 : index
    %29 = vector.load %arg7[%c0_24, %c2_25, %c0_26, %c0_27] : memref<1x4x4x128xf32, #tpu.memory_space<vmem>>, vector<1x1x4x128xf32>
    %30 = vector.shape_cast %29 : vector<1x1x4x128xf32> to vector<4x128xf32>
    %31 = vector.shape_cast %28 : vector<4x128xf32> to vector<1x1x4x128xf32>
    tpu.vector_store %arg7[%c0_24, %c2_25, %c0_26, %c0_27], %31 {strides = array<i32>} : memref<1x4x4x128xf32, #tpu.memory_space<vmem>>, vector<1x1x4x128xf32>,
    %c0_28 = arith.constant 0 : index
    %c3 = arith.constant 3 : index
    %c0_29 = arith.constant 0 : index
    %c0_30 = arith.constant 0 : index
    %32 = vector.load %arg3[%c0_28, %c3, %c0_29, %c0_30] : memref<1x4x4x128xf32, #tpu.memory_space<vmem>>, vector<1x1x4x128xf32>
    %33 = vector.shape_cast %32 : vector<1x1x4x128xf32> to vector<4x128xf32>
    %c64_i32_31 = arith.constant 64 : i32
    %34 = tpu.dynamic_rotate %33 by %c64_i32_31 dim 1 : vector<4x128xf32>, i32 -> vector<4x128xf32>
    %35 = arith.mulf %33, %3 : vector<4x128xf32>
    %36 = arith.mulf %34, %4 : vector<4x128xf32>
    %37 = arith.addf %35, %36 : vector<4x128xf32>
    %c0_32 = arith.constant 0 : index
    %c3_33 = arith.constant 3 : index
    %c0_34 = arith.constant 0 : index
    %c0_35 = arith.constant 0 : index
    %38 = vector.load %arg7[%c0_32, %c3_33, %c0_34, %c0_35] : memref<1x4x4x128xf32, #tpu.memory_space<vmem>>, vector<1x1x4x128xf32>
    %39 = vector.shape_cast %38 : vector<1x1x4x128xf32> to vector<4x128xf32>
    %40 = vector.shape_cast %37 : vector<4x128xf32> to vector<1x1x4x128xf32>
    tpu.vector_store %arg7[%c0_32, %c3_33, %c0_34, %c0_35], %40 {strides = array<i32>} : memref<1x4x4x128xf32, #tpu.memory_space<vmem>>, vector<1x1x4x128xf32>,
    return
  }
  func.func @transform_0(%arg0: i32, %arg1: i32, %arg2: i32) -> (i32, i32, i32, i32) {
    %c0_i32 = arith.constant 0 : i32
    %c0_i32_0 = arith.constant 0 : i32
    return %arg0, %arg2, %arg1, %c0_i32 : i32, i32, i32, i32
  }
  func.func @transform_1(%arg0: i32, %arg1: i32, %arg2: i32) -> (i32, i32, i32) {
    %c0_i32 = arith.constant 0 : i32
    %c0_i32_0 = arith.constant 0 : i32
    return %arg0, %arg1, %c0_i32 : i32, i32, i32
  }
  func.func @transform_2(%arg0: i32, %arg1: i32, %arg2: i32) -> (i32, i32, i32) {
    %c0_i32 = arith.constant 0 : i32
    %c0_i32_0 = arith.constant 0 : i32
    return %arg0, %arg1, %c0_i32 : i32, i32, i32
  }
  func.func @transform_3(%arg0: i32, %arg1: i32, %arg2: i32) -> (i32, i32, i32) {
    %c0_i32 = arith.constant 0 : i32
    %c0_i32_0 = arith.constant 0 : i32
    return %arg0, %arg1, %c0_i32 : i32, i32, i32
  }
  func.func @transform_4(%arg0: i32, %arg1: i32, %arg2: i32) -> (i32, i32, i32, i32) {
    %c0_i32 = arith.constant 0 : i32
    %c0_i32_0 = arith.constant 0 : i32
    return %arg0, %arg2, %arg1, %c0_i32 : i32, i32, i32, i32
  }
}

</mosaic_0001>

<bundles_post_ra>
// kernel: tpu_custom_call.1
= control target key start
LH: loop header
LB: loop body
LE: loop exit
PB: predicated region body
PF: predicated region fallthrough
CT: control target
= control target key end

     0   :  { %s1280_s0 = inlined_call_operand.hbm [shape: f32[2,4,4,128], index: 0, kind: input, shape index: {}]   ;;  %s1281_s1 = inlined_call_operand.hbm [shape: f32[2,4,64], index: 1, kind: input, shape index: {}]   ;;  %s1282_s2 = inlined_call_operand.hbm [shape: f32[2,4,64], index: 2, kind: input, shape index: {}]   ;;  %s1283_s3 = inlined_call_operand.hbm [shape: f32[2,4,1], index: 3, kind: input, shape index: {}]   ;;  %s1284_s4 = inlined_call_operand.hbm [shape: f32[2,4,4,128], index: 4, kind: output, shape index: {}]  }
   0x1   :  { %1292 = sst [smem:[#allocation21_spill]] %s1280_s0 }
   0x2   :  { %1293 = sst [smem:[#allocation22_spill]] %s1281_s1 }
   0x3   :  { %9 = vsyncpa [#allocation5], 0 }
   0x4   :  { %11 = vsyncpa [#allocation5 + $0x1], 0 }
   0x5   :  { %12 = vsyncpa [#allocation8], 0 }
   0x6   :  { %14 = vsyncpa [#allocation8 + $0x1], 0 }
   0x7   :  { %15 = vsyncpa [#allocation11], 0 }
   0x8   :  { %17 = vsyncpa [#allocation11 + $0x1], 0 }
   0x9   :  { %18 = vsyncpa [#allocation6], 0 }
   0xa   :  { %20 = vsyncpa [#allocation6 + $0x1], 0  ;;  %s969_s15 = smov 0   ;;  %s971_s16 = smov 0  }
   0xb   :  { %s973_s17 = smov 0   ;;  %s975_s18 = smov 0  }
   0xc   :  { %s977_s19 = smov 0   ;;  %s979_s20 = smov 0  }
   0xd LB: > { %1294 = sst [smem:[#allocation17_spill]] %s920_s17  ;;  %s1000_s21 = sadd.s32 4294967295, %s932_s20   ;;  %s932_s20 = sphi %s979_s20, %s26_s20   ;;  %s928_s19 = sphi %s977_s19, %s1319_s19   ;;  %s924_s18 = sphi %s975_s18, %s1318_s18   ;;  %s920_s17 = sphi %s973_s17, %s1317_s17   ;;  %s916_s16 = sphi %s971_s16, %s1321_s16   ;;  %s912_s15 = sphi %s969_s15, %s1320_s15  }
   0xe   : > { %1295 = sst [smem:[#allocation18_spill]] %s928_s19  ;;  %s608_s22 = sadd.s32 4294967294, %s932_s20  }
   0xf   : > { %s45_s23 = sadd.s32 1, %s928_s19  ;;  %s56_s24 = sadd.s32 1, %s920_s17 }
  0x10   : > { %p47_p0 = scmp.ge.s32.totalorder %s45_s23, 2  ;;  %p63_p1 = scmp.ne.s32.totalorder %s920_s17, %s916_s16 }
  0x11   : > { %p64_p2 = scmp.eq.s32.totalorder %s932_s20, 0  ;;  %p69_p3 = scmp.ne.s32.totalorder %s916_s16, %s912_s15 }
  0x12   : > { %s1323_s23 = smov (%p47_p0, %s45_s23), 0  ;;  %p70_p5 = scmp.eq.s32.totalorder %s1000_s21, 0 }
  0x13   : > { %1296 = sst [smem:[#allocation19_spill]] %s1323_s23  ;;  %p1012_p4 = por %p64_p2, %p63_p1 }
  0x14   : > { %s49_s26 = ssub.s32 %s928_s19, %s1323_s23  ;;  %p181_p6 = scmp.eq.s32.totalorder %s1000_s21, 1 }
  0x15   : > { %p54_p7 = scmp.eq.s32.totalorder %s49_s26, 0  ;;  %p1020_p8 = por %p70_p5, %p69_p3 }
  0x16   : > { %p1024_p9 = por %p181_p6, %p63_p1  ;;  %p187_p10 = scmp.eq.s32.totalorder %s608_s22, 1 }
  0x17   : > { %s1298_s27 = scalar_select %p1020_p8, 1, 0 }
  0x18   : > { %s1299_s28 = scalar_select %p1024_p9, 1, 0 }
  0x19   : > { %s1029_s29 = scalar_select %p54_p7, %s920_s17, %s56_s24  }
  0x1a   : > { %p1031_p11 = por %p187_p10, %p69_p3  ;;  %p666_p13 = scmp.lt.s32.totalorder %s932_s20, 2 }
  0x1b   : > { %1300 = sst [smem:[#allocation20_spill]] %s1029_s29  ;;  %s1038_s5 = sand.u32 1, %s920_s17  }
  0x1c   : > { %s1301_s30 = scalar_select %p1031_p11, 1, 0 }
  0x1d   : > { %s231_s6 = sand.u32 1, %s932_s20   ;;  %s1042_s7 = sshll.u32 %s1038_s5, 2 }
  0x1e   : > { %p1046_p0 = pnand %p666_p13, %p1012_p4  ;;  %s1051_s9 = sshll.u32 %s928_s19, 6 }
  0x1f   : > { %s1303_s1 = sld [smem:[#allocation22_spill]]  ;;  %s235_s13 = scalar_lea.vmem [#allocation7], %s1042_s7 }
  0x20   : > { %s1302_s8 = scalar_select %p1046_p0, 1, 0 }
  0x21   : > { %s243_s14 = sshll.u32 %s235_s13, 4  ;;  %s1064_s22 = scalar_lea.sflag [#allocation8], %s231_s6  ;;  %s1061_s14 = int_to_ptr.vmem [resolvable:$true] %s243_s14 }
  0x22   : > { %p1070_p4 = pneg %p1046_p0 }
  0x25   : > { %s1057_s12 = scalar_lea.hbm %s1303_s1, %s1051_s9  ;;  %s727_s11 = scalar_lea.hbm %s1303_s1, 128 }
  0x26   : > { %s722_s24 = scalar_lea.hbm %s1057_s12, 64  ;;  %p728_p7 = scmp.lt.u32.totalorder %s1057_s12, %s1303_s1 }
  0x27   : > { %p723_p3 = scmp.ne.s32.totalorder %s1057_s12, %s722_s24  ;;  %p729_p10 = scmp.lt.u32.totalorder %s727_s11, %s722_s24 }
  0x28   : > { %p731_p12 = scmp.lt.u32.totalorder %s722_s24, %s1057_s12 }
  0x29   : > { %p725_p5 = pnand %p1070_p4, %p723_p3  ;;  %p730_p13 = por %p729_p10, %p728_p7 }
  0x2b   : > { %p726_p6 = pneg %p725_p5  ;;  %p732_p1 = por %p731_p12, %p730_p13 }
  0x2d   : > { %p733_p2 = pnand %p732_p1, %p726_p6 }
  0x2f   : > { %736 = shalt.err (!%p733_p2)
}
  0x30   : > { %s737_s6 = scalar_lea.vmem %s1061_s14, 64  ;;  %s934_s26 = smov [#allocation7]  }
  0x31   : > { %p738_p3 = scmp.ne.s32.totalorder %s1061_s14, %s737_s6  ;;  %s742_s10 = sshll.u32 %s934_s26, 4  ;;  %s743_s10 = int_to_ptr.vmem [resolvable:$false] %s742_s10 }
  0x32   : > { %s744_s23 = scalar_lea.vmem %s743_s10, 128  ;;  %p745_p9 = scmp.lt.s32.totalorder %s1061_s14, %s743_s10 }
  0x33   : > { %p740_p5 = pnand %p738_p3, %p1070_p4  ;;  %p746_p8 = scmp.lt.s32.totalorder %s744_s23, %s737_s6 }
  0x35   : > { %p741_p11 = pneg %p740_p5  ;;  %p747_p7 = por %p746_p8, %p745_p9 }
  0x37   : > { %p748_p10 = pnand %p747_p7, %p741_p11 }
  0x39   : > { %751 = shalt.err (!%p748_p10)
}
  0x3a   : > { %655 = dma.hbm_to_vmem [thread:$0]  (!%p1046_p0), %s1057_s12, 64, %s1061_s14, %s1064_s22  }
  0x3b   : > { %p1305_p12 = scmp.lt.s32.totalorder %s932_s20, 3  ;;  %p1306_p1 = scmp.ge.s32.totalorder %s932_s20, 1 }
  0x3c   : > { %s611_s11 = sshll.u32 %s1038_s5, 4  ;;  %s637_s13 = sshll.u32 %s928_s19, 8 }
  0x3d   : > { %p1098_p2 = pnand %p1306_p1, %p1305_p12  ;;  %s1308_s0 = sld [smem:[#allocation21_spill]] }
  0x3e   : > { %s211_s23 = scalar_lea.vmem [#allocation4], %s611_s11  ;;  %s208_s12 = scalar_lea.sflag [#allocation5], %s1038_s5 }
  0x3f   : > { %s1307_s24 = scalar_select %p1098_p2, 1, 0 }
  0x40   : > { %s221_s1 = sshll.u32 %s211_s23, 4  ;;  %s1109_s1 = int_to_ptr.vmem [resolvable:$true] %s221_s1 }
  0x43   : > { %s1107_s10 = scalar_lea.hbm %s1308_s0, %s637_s13  ;;  %s757_s6 = scalar_lea.hbm %s1308_s0, 512 }
  0x44   : > { %s752_s14 = scalar_lea.hbm %s1107_s10, 256  ;;  %p758_p6 = scmp.lt.u32.totalorder %s1107_s10, %s1308_s0 }
  0x45   : > { %p753_p8 = scmp.ne.s32.totalorder %s1107_s10, %s752_s14  ;;  %p759_p13 = scmp.lt.u32.totalorder %s757_s6, %s752_s14 }
  0x46   : > { %p761_p5 = scmp.lt.u32.totalorder %s752_s14, %s1107_s10 }
  0x47   : > { %p755_p9 = pnand %p753_p8, %p1070_p4  ;;  %p760_p3 = por %p759_p13, %p758_p6 }
  0x49   : > { %p756_p11 = pneg %p755_p9  ;;  %p762_p7 = por %p761_p5, %p760_p3 }
  0x4b   : > { %p763_p10 = pnand %p762_p7, %p756_p11 }
  0x4d   : > { %766 = shalt.err (!%p763_p10)
}
  0x4e   : > { %s767_s11 = scalar_lea.vmem %s1109_s1, 256  ;;  %s935_s19 = smov [#allocation4]  }
  0x4f   : > { %p768_p12 = scmp.ne.s32.totalorder %s1109_s1, %s767_s11  ;;  %s772_s29 = sshll.u32 %s935_s19, 4  ;;  %s773_s29 = int_to_ptr.vmem [resolvable:$false] %s772_s29 }
  0x50   : > { %s774_s23 = scalar_lea.vmem %s773_s29, 512  ;;  %p775_p9 = scmp.lt.s32.totalorder %s1109_s1, %s773_s29 }
  0x51   : > { %p770_p1 = pnand %p768_p12, %p1070_p4  ;;  %p776_p2 = scmp.lt.s32.totalorder %s774_s23, %s767_s11 }
  0x53   : > { %p771_p8 = pneg %p770_p1  ;;  %p777_p6 = por %p776_p2, %p775_p9 }
  0x55   : > { %p778_p13 = pnand %p777_p6, %p771_p8 }
  0x57   : > { %781 = shalt.err (!%p778_p13)
}
  0x58   : > { %s936_s14 = smov 64   ;;  %s937_s6 = smov 4  }
  0x59   : > { %652 = dma.hbm_to_vmem [thread:$0]  (!%p1046_p0), %s1107_s10, 256, %s1109_s1, %s208_s12, %s936_s14, %s936_s14, %s937_s6  }
  0x5a   : > { %s1139_s19 = scalar_lea.hbm %s1282_s2, %s1051_s9  ;;  %s254_s11 = scalar_lea.vmem [#allocation9], %s1042_s7 }
  0x5b   : > { %s262_s29 = sshll.u32 %s254_s11, 4  ;;  %s782_s23 = scalar_lea.hbm %s1139_s19, 64  ;;  %s263_s29 = int_to_ptr.vmem [resolvable:$true] %s262_s29 }
  0x5c   : > { %p783_p2 = scmp.ne.s32.totalorder %s1139_s19, %s782_s23  ;;  %s787_s1 = scalar_lea.hbm %s1282_s2, 128 }
  0x5d   : > { %p788_p5 = scmp.lt.u32.totalorder %s1139_s19, %s1282_s2  ;;  %p789_p7 = scmp.lt.u32.totalorder %s787_s1, %s782_s23 }
  0x5e   : > { %p785_p11 = pnand %p783_p2, %p1070_p4  ;;  %p791_p12 = scmp.lt.u32.totalorder %s782_s23, %s1139_s19 }
  0x5f   : > { %p790_p10 = por %p789_p7, %p788_p5 }
  0x60   : > { %p786_p3 = pneg %p785_p11 }
  0x61   : > { %p792_p1 = por %p791_p12, %p790_p10 }
  0x63   : > { %p793_p8 = pnand %p792_p1, %p786_p3 }
  0x65   : > { %796 = shalt.err (!%p793_p8)
}
  0x66   : > { %s797_s14 = scalar_lea.vmem %s263_s29, 64  ;;  %s938_s6 = smov [#allocation9]  }
  0x67   : > { %p798_p9 = scmp.ne.s32.totalorder %s263_s29, %s797_s14  ;;  %s802_s13 = sshll.u32 %s938_s6, 4  ;;  %s803_s13 = int_to_ptr.vmem [resolvable:$false] %s802_s13 }
  0x68   : > { %s804_s0 = scalar_lea.vmem %s803_s13, 128  ;;  %p805_p2 = scmp.lt.s32.totalorder %s263_s29, %s803_s13 }
  0x69   : > { %p800_p6 = pnand %p798_p9, %p1070_p4  ;;  %p806_p11 = scmp.lt.s32.totalorder %s804_s0, %s797_s14 }
  0x6b   : > { %p801_p13 = pneg %p800_p6  ;;  %p807_p0 = por %p806_p11, %p805_p2 }
  0x6d   : > { %p808_p5 = pnand %p807_p0, %p801_p13 }
  0x6f   : > { %811 = shalt.err (!%p808_p5)
}
  0x70   : > { %p1309_p7 = scmp.ne.s32.totalorder %s1302_s8, 0  ;;  %s1164_s11 = scalar_lea.hbm %s1283_s3, %s1051_s9 }
  0x71   : > { %s273_s23 = scalar_lea.vmem [#allocation10], %s1042_s7  ;;  %s270_s10 = scalar_lea.sflag [#allocation11], %s1038_s5 }
  0x72   : > { %658 = dma.hbm_to_vmem [thread:$0]  (!%p1309_p7), %s1139_s19, 64, %s263_s29, %s1064_s22  }
  0x73   : > { %s281_s1 = sshll.u32 %s273_s23, 4  ;;  %s812_s12 = scalar_lea.hbm %s1164_s11, 64  ;;  %s282_s1 = int_to_ptr.vmem [resolvable:$true] %s281_s1 }
  0x74   : > { %p813_p0 = scmp.ne.s32.totalorder %s1164_s11, %s812_s12  ;;  %s817_s19 = scalar_lea.hbm %s1283_s3, 128 }
  0x75   : > { %p818_p12 = scmp.lt.u32.totalorder %s1164_s11, %s1283_s3  ;;  %p819_p1 = scmp.lt.u32.totalorder %s817_s19, %s812_s12 }
  0x76   : > { %p815_p3 = pnand %p813_p0, %p1070_p4  ;;  %p821_p9 = scmp.lt.u32.totalorder %s812_s12, %s1164_s11 }
  0x77   : > { %p820_p8 = por %p819_p1, %p818_p12 }
  0x78   : > { %p816_p10 = pneg %p815_p3 }
  0x79   : > { %p822_p6 = por %p821_p9, %p820_p8 }
  0x7b   : > { %p823_p13 = pnand %p822_p6, %p816_p10 }
  0x7d   : > { %826 = shalt.err (!%p823_p13)
}
  0x7e   : > { %s827_s5 = scalar_lea.vmem %s282_s1, 64  ;;  %s939_s7 = smov [#allocation10]  }
  0x7f   : > { %p828_p2 = scmp.ne.s32.totalorder %s282_s1, %s827_s5  ;;  %s832_s6 = sshll.u32 %s939_s7, 4  ;;  %s833_s6 = int_to_ptr.vmem [resolvable:$false] %s832_s6 }
  0x80   : > { %s834_s13 = scalar_lea.vmem %s833_s6, 128  ;;  %p835_p0 = scmp.lt.s32.totalorder %s282_s1, %s833_s6 }
  0x81   : > { %p830_p11 = pnand %p828_p2, %p1070_p4  ;;  %p836_p3 = scmp.lt.s32.totalorder %s834_s13, %s827_s5 }
  0x83   : > { %p831_p5 = pneg %p830_p11  ;;  %p837_p7 = por %p836_p3, %p835_p0 }
  0x85   : > { %p838_p1 = pnand %p837_p7, %p831_p5 }
  0x87   : > { %841 = shalt.err (!%p838_p1)
}
  0x88   : > { %p1310_p12 = scmp.ne.s32.totalorder %s1302_s8, 0  ;;  %p1311_p10 = scmp.ne.s32.totalorder %s1307_s24, 0 }
  0x89   : > { %s1188_s25 = sand.u32 (!%p1311_p10), 1, %s916_s16   ;;  %p1312_p4 = scmp.ne.s32.totalorder (!%p1311_p10), %s1298_s27, 0 }
  0x8a   : > { %661 = dma.hbm_to_vmem [thread:$0]  (!%p1310_p12), %s1164_s11, 64, %s282_s1, %s270_s10  }
  0x8b   : > { %290 = sbr.rel (%p1311_p10) target bundleno = 429 (0x1ad), region = 36  ;;  %s621_s0 = sshll.u32 (!%p1311_p10), %s1188_s25, 4 }
  0x8c   : > { %s293_s17 = scalar_lea.sflag (!%p1311_p10), [#allocation5], %s1188_s25  ;;  %s1194_s26 = scalar_lea.vmem (!%p1311_p10), [#allocation4], %s621_s0 }
  0x92   : > { %895 = dma.done.wait (%p1312_p4), %s293_s17, 256  }
  0x93   : > { %897 = vsyncadd (%p1312_p4), %s293_s17, 4294967040  ;;  %s301_s8 = sand.u32 1, %s1000_s21   ;;  %s622_s24 = sshll.u32 %s1188_s25, 2 }
  0x94   : > { %s302_s11 = scalar_lea.sflag [#allocation8], %s301_s8  ;;  %s305_s23 = scalar_lea.vmem [#allocation7], %s622_s24 }
  0x95   : > { %899 = dma.done.wait (%p1312_p4), %s302_s11, 128  }
  0x96   : > { %901 = vsyncadd (%p1312_p4), %s302_s11, 4294967168  ;;  %s314_s1 = scalar_lea.vmem [#allocation9], %s622_s24  ;;  %s320_s10 = scalar_lea.sflag [#allocation11], %s1188_s25 }
  0x97   : > { %s323_s12 = scalar_lea.vmem [#allocation10], %s622_s24 }
  0x98   : > { %903 = dma.done.wait (%p1312_p4), %s320_s10, 64  }
  0x99   : > { %905 = vsyncadd (%p1312_p4), %s320_s10, 4294967232  ;;  %v940_v0 = vmov 0   ;;  %v369_v1 = vld [vmem:[%s323_s12] sm:$0xf]  ;;  %v370_v2 = vld [vmem:[%s305_s23] sm:$0xf] }
  0x9a   : > { %721 = vset.pattern.permute.xlu0 %v940_v0  ;;  %v377_v3 = vld [vmem:[%s314_s1] sm:$0xf]  ;;  %s941_s21 = smov 64   ;;  %v626_v7 = vld [vmem:[%s1194_s26 + $0x4] sm:$0xf]  ;;  %vm383_vm0 = vcmask 523264  }
  0x9b   : > { %373 = vperm.xlu0 %721, %v369_v1   ;;  %v395_v8 = vld [vmem:[%s1194_s26] sm:$0xf]  ;;  %v630_v9 = vld [vmem:[%s1194_s26 + $0xc] sm:$0xf]  ;;  %v628_v10 = vld [vmem:[%s1194_s26 + $0x8] sm:$0xf] }
  0x9c   : > { %s362_s27 = scalar_lea.vmem [#allocation12], %s621_s0  ;;  %s638_s22 = sshll.u32 %s924_s18, 8 }
  0x9d   : > { %s446_s14 = sshll.u32 %s362_s27, 4  ;;  %s1229_s9 = scalar_lea.hbm %s1284_s4, %s638_s22  ;;  %s1224_s14 = int_to_ptr.vmem [resolvable:$true] %s446_s14 }
  0x9e   : > { %s430_s18 = scalar_lea.sflag [#allocation6], %s1188_s25  ;;  %s842_s5 = scalar_lea.vmem %s1224_s14, 256 }
  0x9f   : > { %p843_p7 = scmp.ne.s32.totalorder %s1224_s14, %s842_s5  ;;  %p1313_p8 = scmp.ne.s32.totalorder %s1299_s28, 0 }
  0xa0   : > { %s942_s7 = smov [#allocation12]  }
  0xa1   : > { %p844_p9 = pnand %p843_p7, %p1313_p8  ;;  %s846_s6 = sshll.u32 %s942_s7, 4  ;;  %s847_s6 = int_to_ptr.vmem [resolvable:$false] %s846_s6 }
  0xa2   : > { %s848_s13 = scalar_lea.vmem %s847_s6, 512  ;;  %p849_p13 = scmp.lt.s32.totalorder %s1224_s14, %s847_s6 }
  0xa3   : > { %p845_p6 = pneg %p844_p9  ;;  %p850_p2 = scmp.lt.s32.totalorder %s848_s13, %s842_s5 }
  0xa5   : > { %p851_p11 = por %p850_p2, %p849_p13 }
  0xa7   : > { %p852_p5 = pnand %p851_p11, %p845_p6 }
 0x11a   : > { %v374_v4 = vpop.permute.xlu0 %373 }
 0x11b   : > { %v376_v5 = vmul.f32 %v374_v4, %v370_v2  ;;  %v378_v6 = vmul.f32 %v377_v3, %v374_v4 }
 0x11d   : > { %380 = vrot.lane.b32.xlu0 %v376_v5, %s941_s21  ;;  %387 = vrot.lane.b32.xlu1 %v378_v6, %s941_s21  ;;  %v385_v11 = vsub.f32 0.0, %v378_v6 }
 0x121   : > { %404 = vrot.lane.b32.xlu0 %v626_v7, %s941_s21  ;;  %396 = vrot.lane.b32.xlu1 %v395_v8, %s941_s21 }
 0x125   : > { %422 = vrot.lane.b32.xlu0 %v630_v9, %s941_s21  ;;  %413 = vrot.lane.b32.xlu1 %v628_v10, %s941_s21 }
 0x18f   : > { %v381_v12 = vpop.permute.xlu0 %380  ;;  %v388_v13 = vpop.permute.xlu1 %387 }
 0x190   : > { %v384_v14 = vsel %vm383_vm0, %v376_v5, %v381_v12  ;;  %v390_v15 = vsel %vm383_vm0, %v385_v11, %v388_v13 }
 0x191   : > { %391 = vst [vmem:[#allocation2] sm:$0xf] %v384_v14  ;;  %392 = vst [vmem:[#allocation3] sm:$0xf] %v390_v15 }
 0x193   : > { %v405_v16 = vpop.permute.xlu0 %404  ;;  %v397_v17 = vpop.permute.xlu1 %396 }
 0x197   : > { %v423_v18 = vpop.permute.xlu0 %422  ;;  %v414_v19 = vpop.permute.xlu1 %413 }
 0x198   : > { %v393_v20 = vld [vmem:[#allocation2] sm:$0xf]  ;;  %v394_v21 = vld [vmem:[#allocation3] sm:$0xf] }
 0x199   : > { %v406_v22 = vmul.f32 %v626_v7, %v393_v20  ;;  %v407_v23 = vmul.f32 %v405_v16, %v394_v21  ;;  %v398_v24 = vmul.f32 %v395_v8, %v393_v20  ;;  %v399_v25 = vmul.f32 %v397_v17, %v394_v21 }
 0x19a   : > { %v424_v26 = vmul.f32 %v630_v9, %v393_v20  ;;  %v425_v27 = vmul.f32 %v423_v18, %v394_v21  ;;  %v415_v28 = vmul.f32 %v628_v10, %v393_v20  ;;  %v416_v29 = vmul.f32 %v414_v19, %v394_v21 }
 0x19b   : > { %v408_v30 = vadd.f32 %v407_v23, %v406_v22  ;;  %v400_v31 = vadd.f32 %v399_v25, %v398_v24 }
 0x19c   : > { %v426_v32 = vadd.f32 %v425_v27, %v424_v26  ;;  %v417_v33 = vadd.f32 %v416_v29, %v415_v28 }
 0x19d   : > { %627 = vst [vmem:[%s362_s27 + $0x4] sm:$0xf] %v408_v30  ;;  %401 = vst [vmem:[%s362_s27] sm:$0xf] %v400_v31 }
 0x19e   : > { %631 = vst [vmem:[%s362_s27 + $0xc] sm:$0xf] %v426_v32  ;;  %629 = vst [vmem:[%s362_s27 + $0x8] sm:$0xf] %v417_v33 }
 0x19f   : > { %855 = shalt.err (!%p852_p5)
}
 0x1a0   : > { %s856_s0 = scalar_lea.hbm %s1229_s9, 256  ;;  %s860_s8 = scalar_lea.hbm %s1284_s4, 512 }
 0x1a1   : > { %p857_p0 = scmp.ne.s32.totalorder %s1229_s9, %s856_s0  ;;  %p861_p12 = scmp.lt.u32.totalorder %s1229_s9, %s1284_s4 }
 0x1a2   : > { %p862_p10 = scmp.lt.u32.totalorder %s860_s8, %s856_s0  ;;  %p864_p7 = scmp.lt.u32.totalorder %s856_s0, %s1229_s9 }
 0x1a3   : > { %p858_p3 = pnand %p857_p0, %p1313_p8 }
 0x1a4   : > { %p863_p4 = por %p862_p10, %p861_p12 }
 0x1a5   : > { %p859_p1 = pneg %p858_p3 }
 0x1a6   : > { %p865_p9 = por %p864_p7, %p863_p4 }
 0x1a8   : > { %p866_p6 = pnand %p865_p9, %p859_p1 }
 0x1aa   : > { %869 = shalt.err (!%p866_p6)
}
 0x1ab   : > { %s943_s23 = smov 4  }
 0x1ac   : > { %647 = dma.vmem_to_hbm [thread:$0]  (%p1313_p8), %s1224_s14, 256, %s1229_s9, %s430_s18, %s941_s21, %s941_s21, %s943_s23  }
 0x1ad PF: > { %s461_s1 = sand.u32 1, %s912_s15   ;;  %p1314_p13 = scmp.ne.s32.totalorder %s1301_s30, 0 }
 0x1ae   : > { %p1315_p2 = scmp.ge.s32.totalorder %s932_s20, 2  ;;  %s462_s10 = scalar_lea.sflag [#allocation6], %s461_s1 }
 0x1b0   : > { %p663_p11 = pnand %p1315_p2, %p1314_p13 }
 0x1b2   : > { %907 = dma.done.wait (!%p663_p11), %s462_s10, 256  }
 0x1b3   : > { %909 = vsyncadd (!%p663_p11), %s462_s10, 4294967040  ;;  %s26_s20 = sadd.s32 1, %s932_s20   ;;  %s1316_s28 = sld [smem:[#allocation17_spill]] }
 0x1b4   : > { %p23_p5 = scmp.ge.s32.totalorder %s26_s20, 4   ;;  %s1317_s17 = sld [smem:[#allocation20_spill]] }
 0x1b5   : > { %s1318_s18 = sld [smem:[#allocation18_spill]]  ;;  %s1319_s19 = sld [smem:[#allocation19_spill]] }
 0x1b6   : > { %s1320_s15 = smov %s916_s16  ;;  %25 = sbr.rel (!%p23_p5) target bundleno = 13 (0xd), region = 128 }
 0x1b9   : > { %s1321_s16 = smov %s1316_s28 }
 0x1bd   :  { %467 = vsyncpa [#allocation5], 1 }
 0x1be   :  { %469 = vsyncpa [#allocation5 + $0x1], 1 }
 0x1bf   :  { %470 = vsyncpa [#allocation8], 1 }
 0x1c0   :  { %472 = vsyncpa [#allocation8 + $0x1], 1 }
 0x1c1   :  { %473 = vsyncpa [#allocation11], 1 }
 0x1c2   :  { %475 = vsyncpa [#allocation11 + $0x1], 1 }
 0x1c3   :  { %476 = vsyncpa [#allocation6], 1 }
 0x1c4   :  { %478 = vsyncpa [#allocation6 + $0x1], 1 }

</bundles_post_ra>
